<compile_context>
chip_gen: v5e
topology: v5e:2x2
jax: 0.10.0
libtpu: 0.0.40
codegen_flags: <defaults>
</compile_context>

<pallas_src>
import functools

import jax
import jax.numpy as jnp
from jax.experimental import pallas as pl
from jax.experimental.pallas import tpu as pltpu


def _round_up(x, m):
    return ((x + m - 1) // m) * m


def _vmem_capacity_bytes():
    try:
        return int(pltpu.get_tpu_info().vmem_capacity_bytes)
    except Exception:
        return 64 * 1024 * 1024  # conservative fallback (v7x per-TC VMEM)


def _log_softmax_2col(logits):
    """2-class log_softmax via explicit column slices (no cross-lane reduce)."""
    a = logits[:, 0:1]
    b = logits[:, 1:2]
    m = jnp.maximum(a, b)
    lse = m + jnp.log(jnp.exp(a - m) + jnp.exp(b - m))
    return logits - lse


# -----------------------------------------------------------------------------
# Fused kernel: adjacency VMEM-resident across both layers.
#   phase 0 (per row tile):  P[i]   = relu(Ahat[i,:] @ XW1 + b1) @ W2
#   phase 1 (per row tile):  OUT[i] = log_softmax(Ahat[i,:] @ P + b2)
# -----------------------------------------------------------------------------
def _fused_kernel(adj_ref, xw_ref, b1_ref, w2_ref, b2_ref, o_ref, p_ref, *,
                  tm, n_valid):
    phase = pl.program_id(0)
    i = pl.program_id(1)
    row0 = pl.multiple_of(i * tm, tm)
    adt = adj_ref.dtype

    @pl.when(phase == 0)
    def _layer1():
        strip = adj_ref[pl.ds(row0, tm), :]                          # [tm, Np]
        h = jnp.dot(strip, xw_ref[...].astype(adt),
                    preferred_element_type=jnp.float32)              # [tm, H]
        h = jnp.maximum(h + b1_ref[...], 0.0)
        pb = jnp.dot(h, w2_ref[...], preferred_element_type=jnp.float32)
        # Mask padded rows so the resident P scratch carries no garbage.
        rows = jax.lax.broadcasted_iota(jnp.int32, (tm, 1), 0) + i * tm
        p_ref[pl.ds(row0, tm), :] = jnp.where(rows < n_valid, pb, 0.0)
        # Deterministic phase-0 writeback (overwritten in phase 1).
        o_ref[...] = jnp.zeros_like(o_ref)

    @pl.when(phase == 1)
    def _layer2():
        strip = adj_ref[pl.ds(row0, tm), :]                          # [tm, Np]
        logits = jnp.dot(strip, p_ref[...].astype(adt),
                         preferred_element_type=jnp.float32) + b2_ref[...]
        o_ref[...] = _log_softmax_2col(logits)


# -----------------------------------------------------------------------------
# Streaming fallback, stage 1:  P = relu(Ahat @ XW1 + b1) @ W2
# -----------------------------------------------------------------------------
def _stream_l1_kernel(adj_ref, xw_ref, b1_ref, w2_ref, p_ref, acc_ref, *,
                      tm, tk, n_valid):
    i = pl.program_id(0)
    k = pl.program_id(1)
    adt = adj_ref.dtype

    @pl.when(k == 0)
    def _init():
        acc_ref[...] = jnp.zeros_like(acc_ref)

    # XW1 is a full VMEM-resident operand; take the k-slab with a dynamic slice
    # instead of paying a tiny per-step DMA.
    xw_slab = xw_ref[pl.ds(pl.multiple_of(k * tk, tk), tk), :]
    acc_ref[...] += jnp.dot(adj_ref[...], xw_slab.astype(adt),
                            preferred_element_type=jnp.float32)

    @pl.when(k == pl.num_programs(1) - 1)
    def _finalize():
        h = jnp.maximum(acc_ref[...] + b1_ref[...], 0.0)             # [tm, H]
        pb = jnp.dot(h, w2_ref[...], preferred_element_type=jnp.float32)
        rows = jax.lax.broadcasted_iota(jnp.int32, (tm, 1), 0) + i * tm
        p_ref[...] = jnp.where(rows < n_valid, pb, 0.0)              # [tm, C]


# -----------------------------------------------------------------------------
# Streaming fallback, stage 2:  OUT = log_softmax(Ahat @ P + b2)
# -----------------------------------------------------------------------------
def _stream_l2_kernel(adj_ref, p_ref, b2_ref, o_ref, acc_ref, *, tk):
    k = pl.program_id(1)
    adt = adj_ref.dtype

    @pl.when(k == 0)
    def _init():
        acc_ref[...] = jnp.zeros_like(acc_ref)

    p_slab = p_ref[pl.ds(pl.multiple_of(k * tk, tk), tk), :]
    acc_ref[...] += jnp.dot(adj_ref[...], p_slab.astype(adt),
                            preferred_element_type=jnp.float32)

    @pl.when(k == pl.num_programs(1) - 1)
    def _finalize():
        o_ref[...] = _log_softmax_2col(acc_ref[...] + b2_ref[...])


# -----------------------------------------------------------------------------
# Wrapper
# -----------------------------------------------------------------------------
def eva_gnn_forward(adj_norm, x, w1, b1, w2, b2, *,
                    stream_dtype=jnp.bfloat16,
                    row_tile=512, k_tile=1024,
                    force_streaming=False):
    """EvaGNN forward: log_softmax(Ahat @ relu(Ahat @ X W1 + b1) W2 + b2)."""
    N, F = x.shape
    H = w1.shape[1]
    C = w2.shape[1]
    assert C == 2, "EvaGNN has 2 output classes"
    sbytes = jnp.dtype(stream_dtype).itemsize

    # Dense feature projection in plain XLA (tiny), kept f32.
    hi = jax.lax.Precision.HIGHEST
    xw1 = jnp.dot(x.astype(jnp.float32), w1.astype(jnp.float32), precision=hi)

    b1 = b1.reshape(1, H).astype(jnp.float32)
    b2 = b2.reshape(1, C).astype(jnp.float32)
    w2 = w2.astype(jnp.float32)

    vmem_cap = _vmem_capacity_bytes()

    # -------- fused (adjacency VMEM-resident) candidate ---------------------
    base = _round_up(max(N, 1), 128)
    tm_f = min(512, base)
    npad_f = _round_up(base, tm_f)
    # Generous VMEM estimate (lane padding of the narrow operands included).
    fused_need = (npad_f * npad_f * sbytes            # Ahat resident
                  + npad_f * 128 * (4 + sbytes)       # XW1 resident (+ bf16 cast)
                  + npad_f * 128 * 4                  # P scratch (lane padded)
                  + 2 * tm_f * npad_f * sbytes        # row-strip temporaries
                  + 4 * tm_f * 128 * 4                # h / logits / out buffers
                  + (8 << 20))                        # headroom
    use_fused = (not force_streaming) and fused_need <= int(0.85 * vmem_cap)

    if use_fused:
        npad, tm = npad_f, tm_f
        n_rows = npad // tm
        adj_p = jnp.zeros((npad, npad), stream_dtype).at[:N, :N].set(
            adj_norm.astype(stream_dtype))
        xw_p = jnp.zeros((npad, H), jnp.float32).at[:N, :].set(xw1)
        vmem_limit = int(min(max(fused_need, 32 << 20), int(0.95 * vmem_cap)))

        out = pl.pallas_call(
            functools.partial(_fused_kernel, tm=tm, n_valid=N),
            out_shape=jax.ShapeDtypeStruct((npad, C), jnp.float32),
            grid=(2, n_rows),
            in_specs=[
                pl.BlockSpec(memory_space=pltpu.MemorySpace.VMEM),  # Ahat
                pl.BlockSpec(memory_space=pltpu.MemorySpace.VMEM),  # XW1
                pl.BlockSpec(memory_space=pltpu.MemorySpace.VMEM),  # b1
                pl.BlockSpec(memory_space=pltpu.MemorySpace.VMEM),  # W2
                pl.BlockSpec(memory_space=pltpu.MemorySpace.VMEM),  # b2
            ],
            out_specs=pl.BlockSpec((tm, C), lambda p, i: (i, 0)),
            scratch_shapes=[pltpu.VMEM((npad, C), jnp.float32)],    # P
            compiler_params=pltpu.CompilerParams(
                # Both axes sequential: phase-1 reads P produced by ALL phase-0
                # row tiles, so rows cannot be sharded across cores here.
                dimension_semantics=("arbitrary", "arbitrary"),
                vmem_limit_bytes=vmem_limit,
            ),
            cost_estimate=pl.CostEstimate(
                flops=int(2 * npad * npad * (H + C) + 2 * npad * H * C),
                transcendentals=int(3 * npad),
                bytes_accessed=int(npad * npad * sbytes + npad * H * 4
                                   + 2 * npad * C * 4),
            ),
        )(adj_p, xw_p, b1, w2, b2)
        return out[:N]

    # -------- streaming fallback (adjacency too big for VMEM) ---------------
    tm = min(row_tile, base)
    tk = min(k_tile, base)
    tk = max(tk, tm)
    tk = (tk // tm) * tm                 # tk multiple of tm -> padding gran = tk
    npad = _round_up(base, tk)
    n_row = npad // tm
    n_k = npad // tk

    adj_p = jnp.zeros((npad, npad), stream_dtype).at[:N, :N].set(
        adj_norm.astype(stream_dtype))
    xw_p = jnp.zeros((npad, H), jnp.float32).at[:N, :].set(xw1)

    def _vlimit(need):
        return int(min(max(need, 32 << 20), int(0.9 * vmem_cap)))

    # ---- stage 1: P = relu(Ahat @ XW1 + b1) @ W2 ---------------------------
    need1 = (2 * tm * tk * sbytes + npad * 128 * (4 + sbytes)
             + 2 * tm * 128 * 4 + tm * 128 * 4 + (8 << 20))
    p = pl.pallas_call(
        functools.partial(_stream_l1_kernel, tm=tm, tk=tk, n_valid=N),
        out_shape=jax.ShapeDtypeStruct((npad, C), jnp.float32),
        grid=(n_row, n_k),
        in_specs=[
            pl.BlockSpec((tm, tk), lambda i, k: (i, k)),             # Ahat tile
            pl.BlockSpec(memory_space=pltpu.MemorySpace.VMEM),       # XW1 (res.)
            pl.BlockSpec(memory_space=pltpu.MemorySpace.VMEM),       # b1
            pl.BlockSpec(memory_space=pltpu.MemorySpace.VMEM),       # W2
        ],
        out_specs=pl.BlockSpec((tm, C), lambda i, k: (i, 0)),
        scratch_shapes=[pltpu.VMEM((tm, H), jnp.float32)],
        compiler_params=pltpu.CompilerParams(
            dimension_semantics=("parallel", "arbitrary"),
            vmem_limit_bytes=_vlimit(need1),
        ),
        cost_estimate=pl.CostEstimate(
            flops=int(2 * npad * npad * H + 2 * npad * H * C),
            transcendentals=0,
            bytes_accessed=int(npad * npad * sbytes + npad * H * 4
                               + npad * C * 4),
        ),
    )(adj_p, xw_p, b1, w2)

    # ---- stage 2: OUT = log_softmax(Ahat @ P + b2) -------------------------
    need2 = (2 * tm * tk * sbytes + npad * 128 * (4 + sbytes)
             + 2 * tm * 128 * 4 + tm * 128 * 4 + (8 << 20))
    out = pl.pallas_call(
        functools.partial(_stream_l2_kernel, tk=tk),
        out_shape=jax.ShapeDtypeStruct((npad, C), jnp.float32),
        grid=(n_row, n_k),
        in_specs=[
            pl.BlockSpec((tm, tk), lambda i, k: (i, k)),             # Ahat tile
            pl.BlockSpec(memory_space=pltpu.MemorySpace.VMEM),       # P (res.)
            pl.BlockSpec(memory_space=pltpu.MemorySpace.VMEM),       # b2
        ],
        out_specs=pl.BlockSpec((tm, C), lambda i, k: (i, 0)),
        scratch_shapes=[pltpu.VMEM((tm, C), jnp.float32)],
        compiler_params=pltpu.CompilerParams(
            dimension_semantics=("parallel", "arbitrary"),
            vmem_limit_bytes=_vlimit(need2),
        ),
        cost_estimate=pl.CostEstimate(
            flops=int(2 * npad * npad * C),
            transcendentals=int(3 * npad),
            bytes_accessed=int(npad * npad * sbytes + 2 * npad * C * 4),
        ),
    )(adj_p, p, b2)

    return out[:N]


# -----------------------------------------------------------------------------
# Plain-JAX glue: dense normalized adjacency + reference + helpers
# -----------------------------------------------------------------------------
def build_normalized_adjacency(edge_index, num_nodes):
    """Dense D^-1/2 (A + I) D^-1/2 from edge_index [2, E] (JAX glue)."""
    src, dst = edge_index[0], edge_index[1]
    adj = jnp.zeros((num_nodes, num_nodes), jnp.float32)
    adj = adj.at[dst, src].set(1.0)                     # aggregate src -> dst
    eye = jnp.eye(num_nodes, dtype=bool)
    adj = jnp.where(eye, 1.0, adj)                      # add self loops
    deg = jnp.sum(adj, axis=1)
    dinv = jnp.where(deg > 0, 1.0 / jnp.sqrt(deg), 0.0)
    return dinv[:, None] * adj * dinv[None, :]


def glorot(key, shape):
    fan_in, fan_out = shape
    limit = jnp.sqrt(6.0 / (fan_in + fan_out))
    return jax.random.uniform(key, shape, jnp.float32, -limit, limit)


def _reference(adj_norm, x, w1, b1, w2, b2):
    hi = jax.lax.Precision.HIGHEST
    h = jnp.maximum(
        jnp.dot(adj_norm, jnp.dot(x, w1, precision=hi), precision=hi) + b1, 0.0)
    h2 = jnp.dot(adj_norm, jnp.dot(h, w2, precision=hi), precision=hi) + b2
    return jax.nn.log_softmax(h2, axis=1)


def _ring_edges(n):
    idx = jnp.arange(n)
    src = jnp.concatenate([idx, (idx + 1) % n])
    dst = jnp.concatenate([(idx + 1) % n, idx])
    return jnp.stack([src, dst]).astype(jnp.int32)


if __name__ == "__main__":
    key = jax.random.PRNGKey(0)
    k_x, k_w1, k_b1, k_w2, k_b2, k_x2 = jax.random.split(key, 6)

    hidden, n_classes = 16, 2
    input_dim = 8

    # Shared parameters (GCNConv(input_dim,16) / GCNConv(16,2)).
    w1 = glorot(k_w1, (input_dim, hidden))
    b1 = 0.1 * jax.random.normal(k_b1, (1, hidden), jnp.float32)
    w2 = glorot(k_w2, (hidden, n_classes))
    b2 = 0.1 * jax.random.normal(k_b2, (1, n_classes), jnp.float32)

    # ---- case 1: toy ring graph (N=8), fused path, strict f32 check --------
    N1 = 8
    x1 = jax.random.normal(k_x, (N1, input_dim), jnp.float32)
    adj1 = build_normalized_adjacency(_ring_edges(N1), N1)
    ref1 = _reference(adj1, x1, w1, b1, w2, b2)

    out1_f32 = jax.block_until_ready(
        eva_gnn_forward(adj1, x1, w1, b1, w2, b2, stream_dtype=jnp.float32))
    assert out1_f32.shape == (N1, n_classes)
    assert jnp.allclose(out1_f32, ref1, atol=1e-3, rtol=1e-3), "f32 mismatch (N=8)"

    out1_bf16 = jax.block_until_ready(
        eva_gnn_forward(adj1, x1, w1, b1, w2, b2, stream_dtype=jnp.bfloat16))
    assert jnp.allclose(out1_bf16, ref1, atol=5e-2, rtol=5e-2), "bf16 mismatch (N=8)"

    # ---- case 2: larger ring graph (N=300), fused path ----------------------
    N2 = 300
    x2 = jax.random.normal(k_x2, (N2, input_dim), jnp.float32)
    adj2 = build_normalized_adjacency(_ring_edges(N2), N2)
    ref2 = _reference(adj2, x2, w1, b1, w2, b2)

    out2_f32 = jax.block_until_ready(
        eva_gnn_forward(adj2, x2, w1, b1, w2, b2, stream_dtype=jnp.float32))
    assert out2_f32.shape == (N2, n_classes)
    assert jnp.allclose(out2_f32, ref2, atol=1e-3, rtol=1e-3), "f32 mismatch (N=300)"

    out2_bf16 = jax.block_until_ready(
        eva_gnn_forward(adj2, x2, w1, b1, w2, b2, stream_dtype=jnp.bfloat16))
    assert jnp.allclose(out2_bf16, ref2, atol=5e-2, rtol=5e-2), "bf16 mismatch (N=300)"

    # ---- case 3: exercise the large-N streaming fallback explicitly ---------
    out2_stream = jax.block_until_ready(
        eva_gnn_forward(adj2, x2, w1, b1, w2, b2, stream_dtype=jnp.float32,
                        force_streaming=True))
    assert jnp.allclose(out2_stream, ref2, atol=1e-3, rtol=1e-3), \
        "f32 mismatch (N=300, streaming)"

    out2_stream_bf16 = jax.block_until_ready(
        eva_gnn_forward(adj2, x2, w1, b1, w2, b2, stream_dtype=jnp.bfloat16,
                        force_streaming=True))
    assert jnp.allclose(out2_stream_bf16, ref2, atol=5e-2, rtol=5e-2), \
        "bf16 mismatch (N=300, streaming)"

    print("KERNEL_OK")
</pallas_src>

<mosaic_0001>
module attributes {stable_mosaic.version = 11 : i64} {
  func.func @_fused_kernel(%arg0: i32, %arg1: i32, %arg2: memref<128x128xf32, #tpu.memory_space<vmem>>, %arg3: memref<128x16xf32, #tpu.memory_space<vmem>>, %arg4: memref<1x16xf32, #tpu.memory_space<vmem>>, %arg5: memref<16x2xf32, #tpu.memory_space<vmem>>, %arg6: memref<1x2xf32, #tpu.memory_space<vmem>>, %arg7: memref<128x2xf32, #tpu.memory_space<vmem>>, %arg8: memref<128x2xf32, #tpu.memory_space<vmem>>) attributes {dimension_semantics = [#tpu.dimension_semantics<arbitrary>, #tpu.dimension_semantics<arbitrary>], iteration_bounds = array<i64: 2, 1>, scalar_prefetch = 0 : i64, scratch_operands = 1 : i64, tpu.core_type = #tpu.core_type<tc>, window_params = [{pipeline_mode = #tpu.pipeline_mode<synchronous>, transform_indices = @transform_0, window_bounds = array<i64: 128, 128>}, {pipeline_mode = #tpu.pipeline_mode<synchronous>, transform_indices = @transform_1, window_bounds = array<i64: 128, 16>}, {pipeline_mode = #tpu.pipeline_mode<synchronous>, transform_indices = @transform_2, window_bounds = array<i64: 1, 16>}, {pipeline_mode = #tpu.pipeline_mode<synchronous>, transform_indices = @transform_3, window_bounds = array<i64: 16, 2>}, {pipeline_mode = #tpu.pipeline_mode<synchronous>, transform_indices = @transform_4, window_bounds = array<i64: 1, 2>}, {transform_indices = @transform_5, window_bounds = array<i64: 128, 2>}]} {
    %c128_i32 = arith.constant 128 : i32
    %0 = arith.muli %arg1, %c128_i32 : i32
    %1 = tpu.assume_multiple %0, 128 : i32
    %c0_i32 = arith.constant 0 : i32
    %2 = arith.cmpi eq, %arg0, %c0_i32 : i32
    %3 = arith.extui %2 : i1 to i32
    %c0_i32_0 = arith.constant 0 : i32
    %4 = arith.cmpi ne, %3, %c0_i32_0 : i32
    scf.if %4 {
      %8 = arith.index_cast %1 : i32 to index
      %c0 = arith.constant 0 : index
      %9 = vector.load %arg2[%8, %c0] : memref<128x128xf32, #tpu.memory_space<vmem>>, vector<128x128xf32>
      %c0_2 = arith.constant 0 : index
      %c0_3 = arith.constant 0 : index
      %10 = vector.load %arg3[%c0_2, %c0_3] : memref<128x16xf32, #tpu.memory_space<vmem>>, vector<128x16xf32>
      %cst = arith.constant dense<0.000000e+00> : vector<128x16xf32>
      %11 = tpu.matmul %9, %10, %cst {dimension_numbers = #tpu.dot_dimension_numbers<[1], [0], [0], [1], [0, 0, 1, 1], [], []>} : vector<128x128xf32>, vector<128x16xf32>, vector<128x16xf32> -> vector<128x16xf32>
      %c0_4 = arith.constant 0 : index
      %c0_5 = arith.constant 0 : index
      %12 = vector.load %arg4[%c0_4, %c0_5] : memref<1x16xf32, #tpu.memory_space<vmem>>, vector<1x16xf32>
      %13 = vector.broadcast %12 : vector<1x16xf32> to vector<128x16xf32>
      %14 = arith.addf %11, %13 : vector<128x16xf32>
      %cst_6 = arith.constant 0.000000e+00 : f32
      %15 = vector.broadcast %cst_6 : f32 to vector<128x16xf32>
      %16 = arith.maximumf %14, %15 : vector<128x16xf32>
      %c0_7 = arith.constant 0 : index
      %c0_8 = arith.constant 0 : index
      %17 = vector.load %arg5[%c0_7, %c0_8] : memref<16x2xf32, #tpu.memory_space<vmem>>, vector<16x2xf32>
      %cst_9 = arith.constant dense<0.000000e+00> : vector<128x2xf32>
      %18 = tpu.matmul %16, %17, %cst_9 {dimension_numbers = #tpu.dot_dimension_numbers<[1], [0], [0], [1], [0, 0, 1, 1], [], []>} : vector<128x16xf32>, vector<16x2xf32>, vector<128x2xf32> -> vector<128x2xf32>
      %19 = tpu.iota {dimensions = array<i32: 0>} : vector<128x1xi32>
      %c128_i32_10 = arith.constant 128 : i32
      %20 = arith.muli %arg1, %c128_i32_10 : i32
      %21 = vector.broadcast %20 : i32 to vector<128x1xi32>
      %22 = arith.addi %19, %21 : vector<128x1xi32>
      %c8_i32 = arith.constant 8 : i32
      %23 = vector.broadcast %c8_i32 : i32 to vector<128x1xi32>
      %24 = arith.cmpi slt, %22, %23 : vector<128x1xi32>
      %cst_11 = arith.constant 0.000000e+00 : f32
      %25 = vector.shape_cast %24 : vector<128x1xi1> to vector<128x1xi1>
      %26 = vector.broadcast %25 : vector<128x1xi1> to vector<128x2xi1>
      %27 = vector.broadcast %cst_11 : f32 to vector<128x2xf32>
      %28 = arith.select %26, %18, %27 : vector<128x2xi1>, vector<128x2xf32>
      %29 = arith.index_cast %1 : i32 to index
      %c0_12 = arith.constant 0 : index
      %30 = vector.load %arg8[%29, %c0_12] : memref<128x2xf32, #tpu.memory_space<vmem>>, vector<128x2xf32>
      tpu.vector_store %arg8[%29, %c0_12], %28 {strides = array<i32>} : memref<128x2xf32, #tpu.memory_space<vmem>>, vector<128x2xf32>,
      %cst_13 = arith.constant 0.000000e+00 : f32
      %31 = vector.broadcast %cst_13 : f32 to vector<128x2xf32>
      %c0_14 = arith.constant 0 : index
      %c0_15 = arith.constant 0 : index
      %32 = vector.load %arg7[%c0_14, %c0_15] : memref<128x2xf32, #tpu.memory_space<vmem>>, vector<128x2xf32>
      tpu.vector_store %arg7[%c0_14, %c0_15], %31 {strides = array<i32>} : memref<128x2xf32, #tpu.memory_space<vmem>>, vector<128x2xf32>,
    } else {
    }
    %c1_i32 = arith.constant 1 : i32
    %5 = arith.cmpi eq, %arg0, %c1_i32 : i32
    %6 = arith.extui %5 : i1 to i32
    %c0_i32_1 = arith.constant 0 : i32
    %7 = arith.cmpi ne, %6, %c0_i32_1 : i32
    scf.if %7 {
      %8 = arith.index_cast %1 : i32 to index
      %c0 = arith.constant 0 : index
      %9 = vector.load %arg2[%8, %c0] : memref<128x128xf32, #tpu.memory_space<vmem>>, vector<128x128xf32>
      %c0_2 = arith.constant 0 : index
      %c0_3 = arith.constant 0 : index
      %10 = vector.load %arg8[%c0_2, %c0_3] : memref<128x2xf32, #tpu.memory_space<vmem>>, vector<128x2xf32>
      %cst = arith.constant dense<0.000000e+00> : vector<128x2xf32>
      %11 = tpu.matmul %9, %10, %cst {dimension_numbers = #tpu.dot_dimension_numbers<[1], [0], [0], [1], [0, 0, 1, 1], [], []>} : vector<128x128xf32>, vector<128x2xf32>, vector<128x2xf32> -> vector<128x2xf32>
      %c0_4 = arith.constant 0 : index
      %c0_5 = arith.constant 0 : index
      %12 = vector.load %arg6[%c0_4, %c0_5] : memref<1x2xf32, #tpu.memory_space<vmem>>, vector<1x2xf32>
      %13 = vector.broadcast %12 : vector<1x2xf32> to vector<128x2xf32>
      %14 = arith.addf %11, %13 : vector<128x2xf32>
      %15 = vector.extract_strided_slice %14 {offsets = [0, 0], sizes = [128, 1], strides = [1, 1]} : vector<128x2xf32> to vector<128x1xf32>
      %16 = vector.extract_strided_slice %14 {offsets = [0, 1], sizes = [128, 1], strides = [1, 1]} : vector<128x2xf32> to vector<128x1xf32>
      %17 = arith.maximumf %15, %16 : vector<128x1xf32>
      %18 = arith.subf %15, %17 : vector<128x1xf32>
      %19 = math.exp %18 : vector<128x1xf32>
      %20 = arith.subf %16, %17 : vector<128x1xf32>
      %21 = math.exp %20 : vector<128x1xf32>
      %22 = arith.addf %19, %21 : vector<128x1xf32>
      %23 = math.log %22 : vector<128x1xf32>
      %24 = arith.addf %17, %23 : vector<128x1xf32>
      %25 = vector.broadcast %24 : vector<128x1xf32> to vector<128x2xf32>
      %26 = arith.subf %14, %25 : vector<128x2xf32>
      %c0_6 = arith.constant 0 : index
      %c0_7 = arith.constant 0 : index
      %27 = vector.load %arg7[%c0_6, %c0_7] : memref<128x2xf32, #tpu.memory_space<vmem>>, vector<128x2xf32>
      tpu.vector_store %arg7[%c0_6, %c0_7], %26 {strides = array<i32>} : memref<128x2xf32, #tpu.memory_space<vmem>>, vector<128x2xf32>,
    } else {
    }
    return
  }
  func.func @transform_0(%arg0: i32, %arg1: i32) -> (i32, i32) {
    %c0_i32 = arith.constant 0 : i32
    %c0_i32_0 = arith.constant 0 : i32
    %c0_i32_1 = arith.constant 0 : i32
    return %c0_i32, %c0_i32_0 : i32, i32
  }
  func.func @transform_1(%arg0: i32, %arg1: i32) -> (i32, i32) {
    %c0_i32 = arith.constant 0 : i32
    %c0_i32_0 = arith.constant 0 : i32
    %c0_i32_1 = arith.constant 0 : i32
    return %c0_i32, %c0_i32_0 : i32, i32
  }
  func.func @transform_2(%arg0: i32, %arg1: i32) -> (i32, i32) {
    %c0_i32 = arith.constant 0 : i32
    %c0_i32_0 = arith.constant 0 : i32
    %c0_i32_1 = arith.constant 0 : i32
    return %c0_i32, %c0_i32_0 : i32, i32
  }
  func.func @transform_3(%arg0: i32, %arg1: i32) -> (i32, i32) {
    %c0_i32 = arith.constant 0 : i32
    %c0_i32_0 = arith.constant 0 : i32
    %c0_i32_1 = arith.constant 0 : i32
    return %c0_i32, %c0_i32_0 : i32, i32
  }
  func.func @transform_4(%arg0: i32, %arg1: i32) -> (i32, i32) {
    %c0_i32 = arith.constant 0 : i32
    %c0_i32_0 = arith.constant 0 : i32
    %c0_i32_1 = arith.constant 0 : i32
    return %c0_i32, %c0_i32_0 : i32, i32
  }
  func.func @transform_5(%arg0: i32, %arg1: i32) -> (i32, i32) {
    %c0_i32 = arith.constant 0 : i32
    %c0_i32_0 = arith.constant 0 : i32
    return %arg1, %c0_i32 : i32, i32
  }
}

</mosaic_0001>

<bundles_post_ra>
// kernel: tpu_custom_call.1
= control target key start
LH: loop header
LB: loop body
LE: loop exit
PB: predicated region body
PF: predicated region fallthrough
CT: control target
= control target key end

     0   :  { %s1526_s18 = smov 0   ;;  %s1528_s19 = smov 0   ;;  %s2113_s0 = inlined_call_operand.vmem [shape: f32[128,128], index: 0, kind: input, shape index: {}]   ;;  %s2114_s1 = inlined_call_operand.vmem [shape: f32[128,16], index: 1, kind: input, shape index: {}]   ;;  %s2115_s2 = inlined_call_operand.vmem [shape: f32[1,16], index: 2, kind: input, shape index: {}]   ;;  %s2116_s3 = inlined_call_operand.vmem [shape: f32[16,2], index: 3, kind: input, shape index: {}]   ;;  %s2117_s4 = inlined_call_operand.vmem [shape: f32[1,2], index: 4, kind: input, shape index: {}]   ;;  %s2118_s5 = inlined_call_operand.vmem [shape: f32[128,2], index: 5, kind: output, shape index: {}]  }
   0x1   :  { %s1530_s20 = smov 0  }
   0x2 LB: > { %s27_s21 = sadd.s32 1, %s1486_s19  ;;  %p1234_p0 = scmp.ge.s32.totalorder %s1490_s20, 1  ;;  %s1490_s20 = sphi %s1530_s20, %s15_s20   ;;  %s1486_s19 = sphi %s1528_s19, %s2120_s19   ;;  %s1482_s18 = sphi %s1526_s18, %s2119_s18  }
   0x3   : > { %p29_p1 = scmp.ge.s32.totalorder %s27_s21, 2  ;;  %p189_p2 = scmp.lt.s32.totalorder %s1490_s20, 3 }
   0x5   : > { %s2122_s21 = smov (%p29_p1, %s27_s21), 0  ;;  %p190_p3 = pnand %p1234_p0, %p189_p2 }
   0x6   : > { %p1235_p4 = scmp.ne.s32.totalorder (!%p190_p3), %s1482_s18, 0 }
   0x7   : > { %193 = sbr.rel (%p190_p3) target bundleno = 1078 (0x436), region = 40 }
   0xc   : > { %222 = sbr.rel (%p1235_p4) target bundleno = 381 (0x17d), region = 44 }
  0x11   : > { %v255_v0 = vld [vmem:[%s2114_s1 + $0x78] sm:$0xff]  ;;  %v254_v1 = vld [vmem:[%s2114_s1 + $0x70] sm:$0xff]  ;;  %v253_v2 = vld [vmem:[%s2114_s1 + $0x68] sm:$0xff]  ;;  %vm343_vm0 = vcmask 130048   ;;  %vm556_vm1 = vcmask 15360  }
  0x12   : > { %260 = vmatpush.msra.mxu0 %v255_v0  ;;  %1257 = vmatpush.msra.mxu2 %v255_v0  ;;  %v252_v3 = vld [vmem:[%s2114_s1 + $0x60] sm:$0xff]  ;;  %v251_v4 = vld [vmem:[%s2114_s1 + $0x58] sm:$0xff]  ;;  %v250_v5 = vld [vmem:[%s2114_s1 + $0x50] sm:$0xff] }
  0x13   : > { %1258 = vmatpush.msra.mxu3 %v255_v0  ;;  %v249_v6 = vld [vmem:[%s2114_s1 + $0x48] sm:$0xff]  ;;  %v248_v7 = vld [vmem:[%s2114_s1 + $0x40] sm:$0xff]  ;;  %v247_v8 = vld [vmem:[%s2114_s1 + $0x38] sm:$0xff] }
  0x14   : > { %261 = vmatpush.msra.mxu0 %v254_v1  ;;  %1259 = vmatpush.msra.mxu2 %v254_v1  ;;  %v246_v9 = vld [vmem:[%s2114_s1 + $0x30] sm:$0xff]  ;;  %v245_v10 = vld [vmem:[%s2114_s1 + $0x28] sm:$0xff]  ;;  %v244_v11 = vld [vmem:[%s2114_s1 + $0x20] sm:$0xff] }
  0x15   : > { %1260 = vmatpush.msra.mxu3 %v254_v1  ;;  %v243_v12 = vld [vmem:[%s2114_s1 + $0x18] sm:$0xff]  ;;  %v242_v13 = vld [vmem:[%s2114_s1 + $0x10] sm:$0xff]  ;;  %v241_v14 = vld [vmem:[%s2114_s1 + $0x8] sm:$0xff] }
  0x16   : > { %262 = vmatpush.msra.mxu0 %v253_v2  ;;  %1261 = vmatpush.msra.mxu2 %v253_v2  ;;  %v240_v15 = vld [vmem:[%s2114_s1] sm:$0xff]  ;;  %v231_v17 = vld [vmem:[%s2113_s0 + $0x38] sm:$0xff]  ;;  %v225_v18 = vld [vmem:[%s2113_s0 + $0x8] sm:$0xff] }
  0x17   : > { %1262 = vmatpush.msra.mxu3 %v253_v2  ;;  %v224_v16 = vld [vmem:[%s2113_s0] sm:$0xff]  ;;  %v226_v20 = vld [vmem:[%s2113_s0 + $0x10] sm:$0xff]  ;;  %v233_v21 = vld [vmem:[%s2113_s0 + $0x48] sm:$0xff] }
  0x18   : > { %263 = vmatpush.msra.mxu0 %v252_v3  ;;  %1263 = vmatpush.msra.mxu2 %v252_v3  ;;  %v232_v19 = vld [vmem:[%s2113_s0 + $0x40] sm:$0xff]  ;;  %v227_v22 = vld [vmem:[%s2113_s0 + $0x18] sm:$0xff]  ;;  %v234_v23 = vld [vmem:[%s2113_s0 + $0x50] sm:$0xff] }
  0x19   : > { %1264 = vmatpush.msra.mxu3 %v252_v3  ;;  %v239_v24 = vld [vmem:[%s2113_s0 + $0x78] sm:$0xff]  ;;  %v228_v25 = vld [vmem:[%s2113_s0 + $0x20] sm:$0xff]  ;;  %v229_v27 = vld [vmem:[%s2113_s0 + $0x28] sm:$0xff] }
  0x1a   : > { %264 = vmatpush.msra.mxu0 %v251_v4  ;;  %1265 = vmatpush.msra.mxu2 %v251_v4  ;;  %v235_v26 = vld [vmem:[%s2113_s0 + $0x58] sm:$0xff]  ;;  %v236_v28 = vld [vmem:[%s2113_s0 + $0x60] sm:$0xff]  ;;  %v230_v29 = vld [vmem:[%s2113_s0 + $0x30] sm:$0xff] }
  0x1b   : > { %1266 = vmatpush.msra.mxu3 %v251_v4  ;;  %v237_v30 = vld [vmem:[%s2113_s0 + $0x68] sm:$0xff]  ;;  %v238_v31 = vld [vmem:[%s2113_s0 + $0x70] sm:$0xff]  ;;  %v341_v33 = vld [vmem:[%s2116_s3] sm:$0xff] }
  0x1c   : > { %265 = vmatpush.msra.mxu0 %v250_v5  ;;  %1267 = vmatpush.msra.mxu2 %v250_v5  ;;  %v342_v32 = vld [vmem:[%s2116_s3 + $0x8] sm:$0xff]  ;;  %v1367_v34 = vld [vmem:[%s2115_s2] ss:$0 sm:$0xff] }
  0x1d   : > { %1268 = vmatpush.msra.mxu3 %v250_v5  ;;  %406 = vmatpush.msra.mxu1 %v342_v32 }
  0x1e   : > { %266 = vmatpush.msra.mxu0 %v249_v6  ;;  %1269 = vmatpush.msra.mxu2 %v249_v6 }
  0x1f   : > { %1270 = vmatpush.msra.mxu3 %v249_v6  ;;  %407 = vmatpush.msra.mxu1 %v341_v33 }
  0x20   : > { %267 = vmatpush.msra.mxu0 %v248_v7  ;;  %1271 = vmatpush.msra.mxu2 %v248_v7 }
  0x21   : > { %1272 = vmatpush.msra.mxu3 %v248_v7 }
  0x22   : > { %268 = vmatpush.msra.mxu0 %v247_v8  ;;  %1273 = vmatpush.msra.mxu2 %v247_v8 }
  0x23   : > { %1274 = vmatpush.msra.mxu3 %v247_v8 }
  0x24   : > { %269 = vmatpush.msra.mxu0 %v246_v9  ;;  %1275 = vmatpush.msra.mxu2 %v246_v9 }
  0x25   : > { %1276 = vmatpush.msra.mxu3 %v246_v9 }
  0x26   : > { %270 = vmatpush.msra.mxu0 %v245_v10  ;;  %1277 = vmatpush.msra.mxu2 %v245_v10 }
  0x27   : > { %1278 = vmatpush.msra.mxu3 %v245_v10 }
  0x28   : > { %271 = vmatpush.msra.mxu0 %v244_v11  ;;  %1279 = vmatpush.msra.mxu2 %v244_v11 }
  0x29   : > { %1280 = vmatpush.msra.mxu3 %v244_v11 }
  0x2a   : > { %272 = vmatpush.msra.mxu0 %v243_v12  ;;  %1281 = vmatpush.msra.mxu2 %v243_v12 }
  0x2b   : > { %1282 = vmatpush.msra.mxu3 %v243_v12 }
  0x2c   : > { %273 = vmatpush.msra.mxu0 %v242_v13  ;;  %1283 = vmatpush.msra.mxu2 %v242_v13 }
  0x2d   : > { %1284 = vmatpush.msra.mxu3 %v242_v13 }
  0x2e   : > { %274 = vmatpush.msra.mxu0 %v241_v14  ;;  %1285 = vmatpush.msra.mxu2 %v241_v14 }
  0x2f   : > { %1286 = vmatpush.msra.mxu3 %v241_v14 }
  0x30   : > { %275 = vmatpush.msra.mxu0 %v240_v15  ;;  %1287 = vmatpush.msra.mxu2 %v240_v15 }
  0x31   : > { %276 = vmatmul.f32.vlgmr.msra.gmra.mxu0 %v224_v16  ;;  %297 = vmatmul.f32.vlgmr.msra.gmra.mxu2 %v231_v17 }
  0x32   : > { %1288 = vmatpush.msra.mxu3 %v240_v15 }
  0x33   : > { %321 = vmatmul.f32.vlgmr.msra.gmra.mxu3 %v239_v24 }
  0x34   : > { %1289 = vmatpush.msrb.mxu3 %v342_v32 }
  0x36   : > { %1290 = vmatpush.msrb.mxu3 %v341_v33 }
  0x39   : > { %279 = vmatmul.f32.gmra.mxu0 %v225_v18  ;;  %300 = vmatmul.f32.gmra.mxu2 %v232_v19  ;;  %v1492_v19 = vmov 0.0  }
  0x3a   : > { %558 = vst.msk [vmem:[#allocation2 + $0x8] sm:$0xff] %vm556_vm1, %v1492_v19 }
  0x3b   : > { %559 = vst.msk [vmem:[#allocation2 + $0x10] sm:$0xff] %vm556_vm1, %v1492_v19 }
  0x3c   : > { %560 = vst.msk [vmem:[#allocation2 + $0x18] sm:$0xff] %vm556_vm1, %v1492_v19 }
  0x3d   : > { %561 = vst.msk [vmem:[#allocation2 + $0x20] sm:$0xff] %vm556_vm1, %v1492_v19 }
  0x3e   : > { %562 = vst.msk [vmem:[#allocation2 + $0x28] sm:$0xff] %vm556_vm1, %v1492_v19 }
  0x3f   : > { %563 = vst.msk [vmem:[#allocation2 + $0x30] sm:$0xff] %vm556_vm1, %v1492_v19 }
  0x40   : > { %564 = vst.msk [vmem:[#allocation2 + $0x38] sm:$0xff] %vm556_vm1, %v1492_v19 }
  0x41   : > { %282 = vmatmul.f32.gmra.mxu0 %v226_v20  ;;  %303 = vmatmul.f32.gmra.mxu2 %v233_v21  ;;  %565 = vst.msk [vmem:[#allocation2 + $0x40] sm:$0xff] %vm556_vm1, %v1492_v19 }
  0x42   : > { %566 = vst.msk [vmem:[#allocation2 + $0x48] sm:$0xff] %vm556_vm1, %v1492_v19 }
  0x43   : > { %567 = vst.msk [vmem:[#allocation2 + $0x50] sm:$0xff] %vm556_vm1, %v1492_v19 }
  0x44   : > { %568 = vst.msk [vmem:[#allocation2 + $0x58] sm:$0xff] %vm556_vm1, %v1492_v19 }
  0x45   : > { %569 = vst.msk [vmem:[#allocation2 + $0x60] sm:$0xff] %vm556_vm1, %v1492_v19 }
  0x46   : > { %570 = vst.msk [vmem:[#allocation2 + $0x68] sm:$0xff] %vm556_vm1, %v1492_v19 }
  0x47   : > { %571 = vst.msk [vmem:[#allocation2 + $0x70] sm:$0xff] %vm556_vm1, %v1492_v19 }
  0x48   : > { %572 = vst.msk [vmem:[#allocation2 + $0x78] sm:$0xff] %vm556_vm1, %v1492_v19 }
  0x49   : > { %285 = vmatmul.f32.gmra.mxu0 %v227_v22  ;;  %306 = vmatmul.f32.gmra.mxu2 %v234_v23  ;;  %573 = vst.msk [vmem:[%s2118_s5] sm:$0xff] %vm556_vm1, %v1492_v19 }
  0x4a   : > { %574 = vst.msk [vmem:[%s2118_s5 + $0x8] sm:$0xff] %vm556_vm1, %v1492_v19 }
  0x4b   : > { %575 = vst.msk [vmem:[%s2118_s5 + $0x10] sm:$0xff] %vm556_vm1, %v1492_v19 }
  0x4c   : > { %576 = vst.msk [vmem:[%s2118_s5 + $0x18] sm:$0xff] %vm556_vm1, %v1492_v19 }
  0x4d   : > { %577 = vst.msk [vmem:[%s2118_s5 + $0x20] sm:$0xff] %vm556_vm1, %v1492_v19 }
  0x4e   : > { %578 = vst.msk [vmem:[%s2118_s5 + $0x28] sm:$0xff] %vm556_vm1, %v1492_v19 }
  0x4f   : > { %579 = vst.msk [vmem:[%s2118_s5 + $0x30] sm:$0xff] %vm556_vm1, %v1492_v19 }
  0x50   : > { %580 = vst.msk [vmem:[%s2118_s5 + $0x38] sm:$0xff] %vm556_vm1, %v1492_v19 }
  0x51   : > { %288 = vmatmul.f32.gmra.mxu0 %v228_v25  ;;  %309 = vmatmul.f32.gmra.mxu2 %v235_v26  ;;  %581 = vst.msk [vmem:[%s2118_s5 + $0x40] sm:$0xff] %vm556_vm1, %v1492_v19 }
  0x52   : > { %582 = vst.msk [vmem:[%s2118_s5 + $0x48] sm:$0xff] %vm556_vm1, %v1492_v19 }
  0x53   : > { %583 = vst.msk [vmem:[%s2118_s5 + $0x50] sm:$0xff] %vm556_vm1, %v1492_v19 }
  0x54   : > { %584 = vst.msk [vmem:[%s2118_s5 + $0x58] sm:$0xff] %vm556_vm1, %v1492_v19 }
  0x55   : > { %585 = vst.msk [vmem:[%s2118_s5 + $0x60] sm:$0xff] %vm556_vm1, %v1492_v19 }
  0x56   : > { %586 = vst.msk [vmem:[%s2118_s5 + $0x68] sm:$0xff] %vm556_vm1, %v1492_v19 }
  0x57   : > { %587 = vst.msk [vmem:[%s2118_s5 + $0x70] sm:$0xff] %vm556_vm1, %v1492_v19 }
  0x58   : > { %588 = vst.msk [vmem:[%s2118_s5 + $0x78] sm:$0xff] %vm556_vm1, %v1492_v19 }
  0x59   : > { %291 = vmatmul.f32.gmra.mxu0 %v229_v27  ;;  %312 = vmatmul.f32.gmra.mxu2 %v236_v28 }
  0x61   : > { %294 = vmatmul.f32.gmra.mxu0 %v230_v29  ;;  %315 = vmatmul.f32.gmra.mxu2 %v237_v30 }
  0x69   : > { %318 = vmatmul.f32.gmra.mxu2 %v238_v31 }
  0xae   : > { %v277_v35 = vpop.f32.mrf.mxu0 }
  0xaf   : > { %v278_v36 = vadd.f32 %v1367_v34, %v277_v35 }
  0xb1   : > { %v325_v37 = vmax.f32 %v278_v36, 0.0 }
  0xb3   : > { %1236 = vmatmul.msk.f32.vlgmr.msra.gmra.mxu1 %vm343_vm0, %v325_v37 }
  0xb4   : > { %v298_v38 = vpop.f32.mrf.mxu2 }
  0xb5   : > { %v299_v5 = vadd.f32 %v1367_v34, %v298_v38 }
  0xb6   : > { %v280_v39 = vpop.f32.mrf.mxu0  ;;  %v322_v12 = vpop.f32.mrf.mxu3 }
  0xb7   : > { %v281_v40 = vadd.f32 %v1367_v34, %v280_v39  ;;  %v332_v8 = vmax.f32 %v299_v5, 0.0  ;;  %v323_v15 = vadd.f32 %v1367_v34, %v322_v12 }
  0xb9   : > { %v326_v41 = vmax.f32 %v281_v40, 0.0  ;;  %v340_v17 = vmax.f32 %v323_v15, 0.0 }
  0xbb   : > { %1237 = vmatmul.msk.f32.gmra.mxu1 %vm343_vm0, %v326_v41 }
  0xbc   : > { %v301_v42 = vpop.f32.mrf.mxu2 }
  0xbd   : > { %v302_v10 = vadd.f32 %v1367_v34, %v301_v42 }
  0xbe   : > { %v283_v43 = vpop.f32.mrf.mxu0 }
  0xbf   : > { %v284_v44 = vadd.f32 %v1367_v34, %v283_v43  ;;  %v333_v14 = vmax.f32 %v302_v10, 0.0 }
  0xc1   : > { %v327_v45 = vmax.f32 %v284_v44, 0.0 }
  0xc3   : > { %1238 = vmatmul.msk.f32.gmra.mxu1 %vm343_vm0, %v327_v45 }
  0xc4   : > { %v304_v46 = vpop.f32.mrf.mxu2 }
  0xc5   : > { %v305_v16 = vadd.f32 %v1367_v34, %v304_v46 }
  0xc6   : > { %v286_v47 = vpop.f32.mrf.mxu0 }
  0xc7   : > { %v287_v48 = vadd.f32 %v1367_v34, %v286_v47  ;;  %v334_v18 = vmax.f32 %v305_v16, 0.0 }
  0xc9   : > { %v328_v49 = vmax.f32 %v287_v48, 0.0 }
  0xcb   : > { %1239 = vmatmul.msk.f32.gmra.mxu1 %vm343_vm0, %v328_v49 }
  0xcc   : > { %v307_v50 = vpop.f32.mrf.mxu2 }
  0xcd   : > { %v308_v51 = vadd.f32 %v1367_v34, %v307_v50 }
  0xce   : > { %v289_v52 = vpop.f32.mrf.mxu0 }
  0xcf   : > { %v335_v53 = vmax.f32 %v308_v51, 0.0  ;;  %v290_v54 = vadd.f32 %v1367_v34, %v289_v52 }
  0xd1   : > { %v329_v55 = vmax.f32 %v290_v54, 0.0  ;;  %1246 = vmatmul.msk.f32.vlgmr.msrb.gmra.mxu3 %vm343_vm0, %v335_v53 }
  0xd3   : > { %1240 = vmatmul.msk.f32.gmra.mxu1 %vm343_vm0, %v329_v55 }
  0xd4   : > { %v310_v56 = vpop.f32.mrf.mxu2 }
  0xd5   : > { %v311_v57 = vadd.f32 %v1367_v34, %v310_v56 }
  0xd6   : > { %v292_v58 = vpop.f32.mrf.mxu0 }
  0xd7   : > { %v336_v59 = vmax.f32 %v311_v57, 0.0  ;;  %v293_v60 = vadd.f32 %v1367_v34, %v292_v58 }
  0xd9   : > { %v330_v61 = vmax.f32 %v293_v60, 0.0  ;;  %1247 = vmatmul.msk.f32.gmra.mxu3 %vm343_vm0, %v336_v59 }
  0xdb   : > { %1241 = vmatmul.msk.f32.gmra.mxu1 %vm343_vm0, %v330_v61 }
  0xdc   : > { %v313_v62 = vpop.f32.mrf.mxu2 }
  0xdd   : > { %v314_v63 = vadd.f32 %v1367_v34, %v313_v62 }
  0xde   : > { %v295_v0 = vpop.f32.mrf.mxu0 }
  0xdf   : > { %v337_v1 = vmax.f32 %v314_v63, 0.0  ;;  %v296_v2 = vadd.f32 %v1367_v34, %v295_v0 }
  0xe1   : > { %v331_v3 = vmax.f32 %v296_v2, 0.0  ;;  %1248 = vmatmul.msk.f32.gmra.mxu3 %vm343_vm0, %v337_v1 }
  0xe3   : > { %1242 = vmatmul.msk.f32.gmra.mxu1 %vm343_vm0, %v331_v3 }
  0xe4   : > { %v316_v4 = vpop.f32.mrf.mxu2 }
  0xe5   : > { %v317_v6 = vadd.f32 %v1367_v34, %v316_v4 }
  0xe7   : > { %v338_v7 = vmax.f32 %v317_v6, 0.0 }
  0xe9   : > { %1249 = vmatmul.msk.f32.gmra.mxu3 %vm343_vm0, %v338_v7 }
  0xeb   : > { %1243 = vmatmul.msk.f32.gmra.mxu1 %vm343_vm0, %v332_v8 }
  0xec   : > { %v319_v9 = vpop.f32.mrf.mxu2 }
  0xed   : > { %v320_v11 = vadd.f32 %v1367_v34, %v319_v9 }
  0xef   : > { %v339_v13 = vmax.f32 %v320_v11, 0.0 }
  0xf1   : > { %1250 = vmatmul.msk.f32.gmra.mxu3 %vm343_vm0, %v339_v13 }
  0xf3   : > { %1244 = vmatmul.msk.f32.gmra.mxu1 %vm343_vm0, %v333_v14 }
  0xf9   : > { %1251 = vmatmul.msk.f32.gmra.mxu3 %vm343_vm0, %v340_v17 }
  0xfb   : > { %1245 = vmatmul.msk.f32.gmra.mxu1 %vm343_vm0, %v334_v18 }
 0x130   : > { %v409_v20 = vpop.f32.mrf.mxu1 }
 0x131   : > { %557 = vst.msk [vmem:[#allocation2] sm:$0xff] %vm556_vm1, %v409_v20 }
 0x138   : > { %v412_v21 = vpop.f32.mrf.mxu1 }
 0x140   : > { %v415_v22 = vpop.f32.mrf.mxu1 }
 0x148   : > { %v418_v23 = vpop.f32.mrf.mxu1 }
 0x150   : > { %v421_v24 = vpop.f32.mrf.mxu1 }
 0x154   : > { %v439_v25 = vpop.f32.mrf.mxu3 }
 0x158   : > { %v424_v26 = vpop.f32.mrf.mxu1 }
 0x15c   : > { %v442_v27 = vpop.f32.mrf.mxu3 }
 0x160   : > { %v427_v28 = vpop.f32.mrf.mxu1 }
 0x164   : > { %v445_v29 = vpop.f32.mrf.mxu3 }
 0x168   : > { %v430_v30 = vpop.f32.mrf.mxu1 }
 0x16c   : > { %v448_v31 = vpop.f32.mrf.mxu3 }
 0x170   : > { %v433_v32 = vpop.f32.mrf.mxu1 }
 0x174   : > { %v451_v33 = vpop.f32.mrf.mxu3 }
 0x178   : > { %v436_v34 = vpop.f32.mrf.mxu1 }
 0x17c   : > { %v454_v35 = vpop.f32.mrf.mxu3 }
 0x17d PF: > { %p1252_p5 = scmp.ne.s32.totalorder %s1482_s18, 1 }
 0x17e   : > { %s1493_s30 = smov (!%p1252_p5), 127   ;;  %s1494_s6 = smov (!%p1252_p5), 1  }
 0x17f   : > { %592 = sbr.rel (%p1252_p5) target bundleno = 1078 (0x436), region = 48 }
 0x184   : > { %v625_v36 = vld [vmem:[#allocation2 + $0x78] sm:$0xff]  ;;  %v624_v37 = vld [vmem:[#allocation2 + $0x70] sm:$0xff]  ;;  %v623_v38 = vld [vmem:[#allocation2 + $0x68] sm:$0xff]  ;;  %vm1159_vm2 = vcmask 15360  }
 0x185   : > { %630 = vmatpush.msra.mxu0 %v625_v36  ;;  %1291 = vmatpush.msra.mxu1 %v625_v36  ;;  %v622_v39 = vld [vmem:[#allocation2 + $0x60] sm:$0xff]  ;;  %v621_v40 = vld [vmem:[#allocation2 + $0x58] sm:$0xff]  ;;  %v620_v41 = vld [vmem:[#allocation2 + $0x50] sm:$0xff] }
 0x186   : > { %1292 = vmatpush.msra.mxu2 %v625_v36  ;;  %1293 = vmatpush.msra.mxu3 %v625_v36  ;;  %v619_v42 = vld [vmem:[#allocation2 + $0x48] sm:$0xff]  ;;  %v618_v43 = vld [vmem:[#allocation2 + $0x40] sm:$0xff]  ;;  %v617_v44 = vld [vmem:[#allocation2 + $0x38] sm:$0xff] }
 0x187   : > { %631 = vmatpush.msra.mxu0 %v624_v37  ;;  %1294 = vmatpush.msra.mxu1 %v624_v37  ;;  %v616_v45 = vld [vmem:[#allocation2 + $0x30] sm:$0xff]  ;;  %v615_v46 = vld [vmem:[#allocation2 + $0x28] sm:$0xff]  ;;  %v614_v47 = vld [vmem:[#allocation2 + $0x20] sm:$0xff] }
 0x188   : > { %1295 = vmatpush.msra.mxu2 %v624_v37  ;;  %1296 = vmatpush.msra.mxu3 %v624_v37  ;;  %v613_v48 = vld [vmem:[#allocation2 + $0x18] sm:$0xff]  ;;  %v612_v49 = vld [vmem:[#allocation2 + $0x10] sm:$0xff]  ;;  %v611_v50 = vld [vmem:[#allocation2 + $0x8] sm:$0xff] }
 0x189   : > { %632 = vmatpush.msra.mxu0 %v623_v38  ;;  %1297 = vmatpush.msra.mxu1 %v623_v38  ;;  %v610_v51 = vld [vmem:[#allocation2] sm:$0xff]  ;;  %v595_v56 = vld [vmem:[%s2113_s0 + $0x8] sm:$0xff]  ;;  %v596_v60 = vld [vmem:[%s2113_s0 + $0x10] sm:$0xff] }
 0x18a   : > { %1298 = vmatpush.msra.mxu2 %v623_v38  ;;  %1299 = vmatpush.msra.mxu3 %v623_v38  ;;  %v594_v52 = vld [vmem:[%s2113_s0] sm:$0xff]  ;;  %v599_v57 = vld [vmem:[%s2113_s0 + $0x28] sm:$0xff]  ;;  %v600_v61 = vld [vmem:[%s2113_s0 + $0x30] sm:$0xff] }
 0x18b   : > { %633 = vmatpush.msra.mxu0 %v622_v39  ;;  %1300 = vmatpush.msra.mxu1 %v622_v39  ;;  %v598_v53 = vld [vmem:[%s2113_s0 + $0x20] sm:$0xff]  ;;  %v603_v58 = vld [vmem:[%s2113_s0 + $0x48] sm:$0xff]  ;;  %v604_v62 = vld [vmem:[%s2113_s0 + $0x50] sm:$0xff] }
 0x18c   : > { %1301 = vmatpush.msra.mxu2 %v622_v39  ;;  %1302 = vmatpush.msra.mxu3 %v622_v39  ;;  %v602_v54 = vld [vmem:[%s2113_s0 + $0x40] sm:$0xff]  ;;  %v607_v59 = vld [vmem:[%s2113_s0 + $0x68] sm:$0xff]  ;;  %v608_v63 = vld [vmem:[%s2113_s0 + $0x70] sm:$0xff] }
 0x18d   : > { %634 = vmatpush.msra.mxu0 %v621_v40  ;;  %1303 = vmatpush.msra.mxu1 %v621_v40  ;;  %v606_v55 = vld [vmem:[%s2113_s0 + $0x60] sm:$0xff]  ;;  %v597_v0 = vld [vmem:[%s2113_s0 + $0x18] sm:$0xff] }
 0x18e   : > { %1304 = vmatpush.msra.mxu2 %v621_v40  ;;  %1305 = vmatpush.msra.mxu3 %v621_v40  ;;  %v601_v1 = vld [vmem:[%s2113_s0 + $0x38] sm:$0xff]  ;;  %v1371_v4 = vld [vmem:[%s2117_s4] ss:$0 sm:$0xff] }
 0x18f   : > { %635 = vmatpush.msra.mxu0 %v620_v41  ;;  %1306 = vmatpush.msra.mxu1 %v620_v41  ;;  %v605_v2 = vld [vmem:[%s2113_s0 + $0x58] sm:$0xff] }
 0x190   : > { %1307 = vmatpush.msra.mxu2 %v620_v41  ;;  %1308 = vmatpush.msra.mxu3 %v620_v41  ;;  %v609_v3 = vld [vmem:[%s2113_s0 + $0x78] sm:$0xff] }
 0x191   : > { %636 = vmatpush.msra.mxu0 %v619_v42  ;;  %1309 = vmatpush.msra.mxu1 %v619_v42 }
 0x192   : > { %1310 = vmatpush.msra.mxu2 %v619_v42  ;;  %1311 = vmatpush.msra.mxu3 %v619_v42 }
 0x193   : > { %637 = vmatpush.msra.mxu0 %v618_v43  ;;  %1312 = vmatpush.msra.mxu1 %v618_v43 }
 0x194   : > { %1313 = vmatpush.msra.mxu2 %v618_v43  ;;  %1314 = vmatpush.msra.mxu3 %v618_v43 }
 0x195   : > { %638 = vmatpush.msra.mxu0 %v617_v44  ;;  %1315 = vmatpush.msra.mxu1 %v617_v44 }
 0x196   : > { %1316 = vmatpush.msra.mxu2 %v617_v44  ;;  %1317 = vmatpush.msra.mxu3 %v617_v44 }
 0x197   : > { %639 = vmatpush.msra.mxu0 %v616_v45  ;;  %1318 = vmatpush.msra.mxu1 %v616_v45 }
 0x198   : > { %1319 = vmatpush.msra.mxu2 %v616_v45  ;;  %1320 = vmatpush.msra.mxu3 %v616_v45 }
 0x199   : > { %640 = vmatpush.msra.mxu0 %v615_v46  ;;  %1321 = vmatpush.msra.mxu1 %v615_v46 }
 0x19a   : > { %1322 = vmatpush.msra.mxu2 %v615_v46  ;;  %1323 = vmatpush.msra.mxu3 %v615_v46 }
 0x19b   : > { %641 = vmatpush.msra.mxu0 %v614_v47  ;;  %1324 = vmatpush.msra.mxu1 %v614_v47 }
 0x19c   : > { %1325 = vmatpush.msra.mxu2 %v614_v47  ;;  %1326 = vmatpush.msra.mxu3 %v614_v47 }
 0x19d   : > { %642 = vmatpush.msra.mxu0 %v613_v48  ;;  %1327 = vmatpush.msra.mxu1 %v613_v48 }
 0x19e   : > { %1328 = vmatpush.msra.mxu2 %v613_v48  ;;  %1329 = vmatpush.msra.mxu3 %v613_v48 }
 0x19f   : > { %643 = vmatpush.msra.mxu0 %v612_v49  ;;  %1330 = vmatpush.msra.mxu1 %v612_v49 }
 0x1a0   : > { %1331 = vmatpush.msra.mxu2 %v612_v49  ;;  %1332 = vmatpush.msra.mxu3 %v612_v49 }
 0x1a1   : > { %644 = vmatpush.msra.mxu0 %v611_v50  ;;  %1333 = vmatpush.msra.mxu1 %v611_v50 }
 0x1a2   : > { %1334 = vmatpush.msra.mxu2 %v611_v50  ;;  %1335 = vmatpush.msra.mxu3 %v611_v50 }
 0x1a3   : > { %645 = vmatpush.msra.mxu0 %v610_v51  ;;  %1336 = vmatpush.msra.mxu1 %v610_v51 }
 0x1a4   : > { %1337 = vmatpush.msra.mxu2 %v610_v51  ;;  %1338 = vmatpush.msra.mxu3 %v610_v51 }
 0x1a5   : > { %646 = vmatmul.f32.vlgmr.msra.gmra.mxu0 %v594_v52  ;;  %658 = vmatmul.f32.vlgmr.msra.gmra.mxu1 %v598_v53 }
 0x1a6   : > { %670 = vmatmul.f32.vlgmr.msra.gmra.mxu2 %v602_v54  ;;  %682 = vmatmul.f32.vlgmr.msra.gmra.mxu3 %v606_v55 }
 0x1ad   : > { %649 = vmatmul.f32.gmra.mxu0 %v595_v56  ;;  %661 = vmatmul.f32.gmra.mxu1 %v599_v57 }
 0x1ae   : > { %673 = vmatmul.f32.gmra.mxu2 %v603_v58  ;;  %685 = vmatmul.f32.gmra.mxu3 %v607_v59 }
 0x1b5   : > { %652 = vmatmul.f32.gmra.mxu0 %v596_v60  ;;  %664 = vmatmul.f32.gmra.mxu1 %v600_v61 }
 0x1b6   : > { %676 = vmatmul.f32.gmra.mxu2 %v604_v62  ;;  %688 = vmatmul.f32.gmra.mxu3 %v608_v63 }
 0x1bd   : > { %655 = vmatmul.f32.gmra.mxu0 %v597_v0  ;;  %667 = vmatmul.f32.gmra.mxu1 %v601_v1 }
 0x1be   : > { %679 = vmatmul.f32.gmra.mxu2 %v605_v2  ;;  %691 = vmatmul.f32.gmra.mxu3 %v609_v3 }
 0x222   : > { %v647_v5 = vpop.f32.mrf.mxu0  ;;  %v659_v6 = vpop.f32.mrf.mxu1 }
 0x223   : > { %v1800_v7 = vadd.f32 %v1371_v4, %v647_v5  ;;  %v1802_v8 = vadd.f32 %v1371_v4, %v659_v6 }
 0x225   : > { %719 = vrot.lane.b32.xlu2 %v1802_v8, %s1493_s30  ;;  %711 = vrot.lane.b32.xlu0 %v1800_v7, %s1493_s30 }
 0x229   : > { %v671_v9 = vpop.f32.mrf.mxu2  ;;  %v683_v10 = vpop.f32.mrf.mxu3 }
 0x22a   : > { %v1808_v11 = vadd.f32 %v1371_v4, %v671_v9  ;;  %v1810_v12 = vadd.f32 %v1371_v4, %v683_v10  ;;  %v650_v13 = vpop.f32.mrf.mxu0  ;;  %v662_v14 = vpop.f32.mrf.mxu1 }
 0x22b   : > { %v1816_v17 = vadd.f32 %v1371_v4, %v662_v14  ;;  %v1820_v19 = vadd.f32 %v1371_v4, %v650_v13 }
 0x22d   : > { %727 = vrot.lane.b32.xlu2 %v1808_v11, %s1493_s30  ;;  %735 = vrot.lane.b32.xlu0 %v1810_v12, %s1493_s30 }
 0x231   : > { %v674_v15 = vpop.f32.mrf.mxu2  ;;  %v686_v16 = vpop.f32.mrf.mxu3 }
 0x232   : > { %v1818_v18 = vadd.f32 %v1371_v4, %v686_v16  ;;  %v653_v20 = vpop.f32.mrf.mxu0  ;;  %v1830_v22 = vadd.f32 %v1371_v4, %v674_v15  ;;  %v665_v25 = vpop.f32.mrf.mxu1 }
 0x233   : > { %v1828_v21 = vadd.f32 %v1371_v4, %v653_v20  ;;  %v1838_v28 = vadd.f32 %v1371_v4, %v665_v25 }
 0x234   : > { %737 = vrot.lane.b32.xlu1 %v1818_v18, %s1493_s30 }
 0x235   : > { %721 = vrot.lane.b32.xlu2 %v1816_v17, %s1493_s30  ;;  %713 = vrot.lane.b32.xlu0 %v1820_v19, %s1493_s30 }
 0x239   : > { %v677_v23 = vpop.f32.mrf.mxu2  ;;  %v689_v24 = vpop.f32.mrf.mxu3 }
 0x23a   : > { %v1836_v26 = vadd.f32 %v1371_v4, %v677_v23  ;;  %v656_v30 = vpop.f32.mrf.mxu0  ;;  %v1848_v32 = vadd.f32 %v1371_v4, %v689_v24  ;;  %v668_v35 = vpop.f32.mrf.mxu1 }
 0x23b   : > { %v1850_v33 = vadd.f32 %v1371_v4, %v656_v30  ;;  %v1860_v36 = vadd.f32 %v1371_v4, %v668_v35 }
 0x23c   : > { %715 = vrot.lane.b32.xlu1 %v1828_v21, %s1493_s30 }
 0x23d   : > { %729 = vrot.lane.b32.xlu0 %v1830_v22, %s1493_s30 }
 0x241   : > { %v680_v27 = vpop.f32.mrf.mxu2  ;;  %v692_v31 = vpop.f32.mrf.mxu3 }
 0x242   : > { %v1840_v29 = vadd.f32 %v1371_v4, %v680_v27  ;;  %v1852_v34 = vadd.f32 %v1371_v4, %v692_v31 }
 0x244   : > { %733 = vrot.lane.b32.xlu2 %v1840_v29, %s1493_s30  ;;  %731 = vrot.lane.b32.xlu1 %v1836_v26, %s1493_s30 }
 0x245   : > { %723 = vrot.lane.b32.xlu0 %v1838_v28, %s1493_s30 }
 0x24c   : > { %739 = vrot.lane.b32.xlu2 %v1848_v32, %s1493_s30  ;;  %717 = vrot.lane.b32.xlu1 %v1850_v33, %s1493_s30 }
 0x24d   : > { %741 = vrot.lane.b32.xlu0 %v1852_v34, %s1493_s30 }
 0x254   : > { %725 = vrot.lane.b32.xlu1 %v1860_v36, %s1493_s30 }
 0x27f   : > { %v720_v37 = vpop.permute.xlu2 %719 }
 0x280   : > { %v1865_v38 = vmax.f32 %v1802_v8, %v720_v37 }
 0x282   : > { %847 = vrot.lane.b32.xlu2 %v1865_v38, %s1494_s6 }
 0x287   : > { %v728_v39 = vpop.permute.xlu2 %727 }
 0x288   : > { %v1870_v40 = vmax.f32 %v1808_v11, %v728_v39 }
 0x28a   : > { %855 = vrot.lane.b32.xlu0 %v1870_v40, %s1494_s6 }
 0x28f   : > { %v722_v41 = vpop.permute.xlu2 %721 }
 0x290   : > { %v1875_v42 = vmax.f32 %v1816_v17, %v722_v41 }
 0x292   : > { %849 = vrot.lane.b32.xlu0 %v1875_v42, %s1494_s6 }
 0x297   : > { %v712_v43 = vpop.permute.xlu0 %711 }
 0x298   : > { %v1880_v44 = vmax.f32 %v1800_v7, %v712_v43 }
 0x29a   : > { %839 = vrot.lane.b32.xlu1 %v1880_v44, %s1494_s6 }
 0x29e   : > { %v734_v54 = vpop.permute.xlu2 %733 }
 0x29f   : > { %v736_v45 = vpop.permute.xlu0 %735  ;;  %v1905_v56 = vmax.f32 %v1840_v29, %v734_v54 }
 0x2a0   : > { %v1885_v46 = vmax.f32 %v1810_v12, %v736_v45 }
 0x2a2   : > { %863 = vrot.lane.b32.xlu1 %v1885_v46, %s1494_s6 }
 0x2a6   : > { %v738_v47 = vpop.permute.xlu1 %737  ;;  %v740_v60 = vpop.permute.xlu2 %739 }
 0x2a7   : > { %v714_v48 = vpop.permute.xlu0 %713  ;;  %v1920_v62 = vmax.f32 %v1848_v32, %v740_v60  ;;  %v1940_v4 = vmax.f32 %v1818_v18, %v738_v47 }
 0x2a8   : > { %v1890_v49 = vmax.f32 %v1820_v19, %v714_v48 }
 0x2aa   : > { %841 = vrot.lane.b32.xlu2 %v1890_v49, %s1494_s6 }
 0x2ae   : > { %v716_v50 = vpop.permute.xlu1 %715 }
 0x2af   : > { %v1895_v51 = vmax.f32 %v1828_v21, %v716_v50  ;;  %v730_v52 = vpop.permute.xlu0 %729 }
 0x2b0   : > { %v1898_v53 = vmax.f32 %v1830_v22, %v730_v52 }
 0x2b1   : > { %843 = vrot.lane.b32.xlu0 %v1895_v51, %s1494_s6 }
 0x2b2   : > { %857 = vrot.lane.b32.xlu1 %v1898_v53, %s1494_s6 }
 0x2b6   : > { %v732_v55 = vpop.permute.xlu1 %731 }
 0x2b7   : > { %v1908_v57 = vmax.f32 %v1836_v26, %v732_v55  ;;  %v724_v58 = vpop.permute.xlu0 %723 }
 0x2b8   : > { %v1911_v59 = vmax.f32 %v1838_v28, %v724_v58 }
 0x2b9   : > { %861 = vrot.lane.b32.xlu0 %v1905_v56, %s1494_s6  ;;  %859 = vrot.lane.b32.xlu2 %v1908_v57, %s1494_s6 }
 0x2ba   : > { %851 = vrot.lane.b32.xlu1 %v1911_v59, %s1494_s6 }
 0x2be   : > { %v718_v61 = vpop.permute.xlu1 %717 }
 0x2bf   : > { %v1923_v63 = vmax.f32 %v1850_v33, %v718_v61  ;;  %v742_v0 = vpop.permute.xlu0 %741 }
 0x2c0   : > { %v1933_v3 = vmax.f32 %v1852_v34, %v742_v0 }
 0x2c1   : > { %867 = vrot.lane.b32.xlu0 %v1920_v62, %s1494_s6 }
 0x2c2   : > { %845 = vrot.lane.b32.xlu1 %v1923_v63, %s1494_s6 }
 0x2c6   : > { %v726_v1 = vpop.permute.xlu1 %725 }
 0x2c7   : > { %v1930_v2 = vmax.f32 %v1860_v36, %v726_v1 }
 0x2c9   : > { %853 = vrot.lane.b32.xlu2 %v1930_v2, %s1494_s6 }
 0x2ca   : > { %869 = vrot.lane.b32.xlu1 %v1933_v3, %s1494_s6 }
 0x2d1   : > { %865 = vrot.lane.b32.xlu2 %v1940_v4, %s1494_s6 }
 0x2dc   : > { %v848_v5 = vpop.permute.xlu2 %847 }
 0x2dd   : > { %v891_v6 = vsub.f32 %v1802_v8, %v848_v5 }
 0x2df   : > { %v911_v9 = vmul.f32 1.442695, %v891_v6 }
 0x2e1   : > { %1372 = vpow2.f32 %v911_v9 }
 0x2e7   : > { %v1373_v10 = vpop.eup %1372 }
 0x2e8   : > { %959 = vrot.lane.b32.xlu0 %v1373_v10, %s1493_s30 }
 0x2fc   : > { %v856_v13 = vpop.permute.xlu0 %855 }
 0x2fd   : > { %v895_v14 = vsub.f32 %v1808_v11, %v856_v13 }
 0x2ff   : > { %v919_v15 = vmul.f32 1.442695, %v895_v14 }
 0x301   : > { %1374 = vpow2.f32 %v919_v15 }
 0x304   : > { %v842_v16 = vpop.permute.xlu2 %841  ;;  %v850_v20 = vpop.permute.xlu0 %849 }
 0x305   : > { %v888_v23 = vsub.f32 %v1820_v19, %v842_v16  ;;  %v892_v24 = vsub.f32 %v1816_v17, %v850_v20 }
 0x307   : > { %v1375_v25 = vpop.eup %1374  ;;  %v905_v27 = vmul.f32 1.442695, %v888_v23  ;;  %v913_v30 = vmul.f32 1.442695, %v892_v24 }
 0x308   : > { %967 = vrot.lane.b32.xlu1 %v1375_v25, %s1493_s30 }
 0x309   : > { %1376 = vpow2.f32 %v905_v27 }
 0x30a   : > { %1378 = vpow2.f32 %v913_v30 }
 0x30c   : > { %v840_v31 = vpop.permute.xlu1 %839 }
 0x30d   : > { %v887_v35 = vsub.f32 %v1800_v7, %v840_v31 }
 0x30f   : > { %v1377_v37 = vpop.eup %1376  ;;  %v903_v39 = vmul.f32 1.442695, %v887_v35 }
 0x310   : > { %v1379_v41 = vpop.eup %1378  ;;  %953 = vrot.lane.b32.xlu0 %v1377_v37, %s1493_s30 }
 0x311   : > { %1380 = vpow2.f32 %v903_v39  ;;  %961 = vrot.lane.b32.xlu1 %v1379_v41, %s1493_s30 }
 0x313   : > { %v860_v43 = vpop.permute.xlu2 %859 }
 0x314   : > { %v897_v45 = vsub.f32 %v1836_v26, %v860_v43  ;;  %v864_v47 = vpop.permute.xlu1 %863 }
 0x315   : > { %v899_v48 = vsub.f32 %v1810_v12, %v864_v47 }
 0x316   : > { %v923_v50 = vmul.f32 1.442695, %v897_v45 }
 0x317   : > { %v1381_v52 = vpop.eup %1380  ;;  %v927_v54 = vmul.f32 1.442695, %v899_v48 }
 0x318   : > { %1382 = vpow2.f32 %v923_v50  ;;  %951 = vrot.lane.b32.xlu2 %v1381_v52, %s1493_s30 }
 0x319   : > { %1384 = vpow2.f32 %v927_v54 }
 0x31e   : > { %v1383_v55 = vpop.eup %1382 }
 0x31f   : > { %v1385_v58 = vpop.eup %1384  ;;  %971 = vrot.lane.b32.xlu0 %v1383_v55, %s1493_s30 }
 0x320   : > { %975 = vrot.lane.b32.xlu2 %v1385_v58, %s1493_s30 }
 0x323   : > { %v854_v60 = vpop.permute.xlu2 %853  ;;  %v844_v61 = vpop.permute.xlu0 %843 }
 0x324   : > { %v894_v0 = vsub.f32 %v1860_v36, %v854_v60  ;;  %v889_v1 = vsub.f32 %v1828_v21, %v844_v61  ;;  %v858_v5 = vpop.permute.xlu1 %857 }
 0x325   : > { %v896_v6 = vsub.f32 %v1830_v22, %v858_v5 }
 0x326   : > { %v917_v9 = vmul.f32 1.442695, %v894_v0  ;;  %v907_v10 = vmul.f32 1.442695, %v889_v1  ;;  %v1495_v1 = vmov 0  }
 0x327   : > { %v921_v13 = vmul.f32 1.442695, %v896_v6  ;;  %1369 = vset.pattern.permute.xlu2 %v1495_v1  ;;  %1368 = vset.pattern.permute.xlu0 %v1495_v1  ;;  %v779_v6 = vsub.f32 %v1802_v8, %v1865_v38 }
 0x328   : > { %1386 = vpow2.f32 %v917_v9  ;;  %1370 = vset.pattern.permute.xlu1 %v1495_v1 }
 0x329   : > { %1388 = vpow2.f32 %v907_v10  ;;  %v799_v9 = vmul.f32 1.442695, %v779_v6 }
 0x32a   : > { %1390 = vpow2.f32 %v921_v13 }
 0x32b   : > { %v866_v14 = vpop.permute.xlu2 %865  ;;  %v862_v15 = vpop.permute.xlu0 %861 }
 0x32c   : > { %v900_v16 = vsub.f32 %v1818_v18, %v866_v14  ;;  %v898_v20 = vsub.f32 %v1840_v29, %v862_v15  ;;  %v852_v23 = vpop.permute.xlu1 %851 }
 0x32d   : > { %v893_v24 = vsub.f32 %v1838_v28, %v852_v23 }
 0x32e   : > { %v1387_v25 = vpop.eup %1386  ;;  %v929_v27 = vmul.f32 1.442695, %v900_v16  ;;  %v925_v30 = vmul.f32 1.442695, %v898_v20  ;;  %v775_v16 = vsub.f32 %v1800_v7, %v1880_v44 }
 0x32f   : > { %v1389_v31 = vpop.eup %1388  ;;  %v915_v35 = vmul.f32 1.442695, %v893_v24  ;;  %965 = vrot.lane.b32.xlu0 %v1387_v25, %s1493_s30  ;;  %v783_v25 = vsub.f32 %v1808_v11, %v1870_v40 }
 0x330   : > { %v1391_v37 = vpop.eup %1390  ;;  %1392 = vpow2.f32 %v929_v27  ;;  %955 = vrot.lane.b32.xlu1 %v1389_v31, %s1493_s30  ;;  %v791_v24 = vmul.f32 1.442695, %v775_v16  ;;  %v787_v27 = vsub.f32 %v1810_v12, %v1885_v46 }
 0x331   : > { %1394 = vpow2.f32 %v925_v30  ;;  %969 = vrot.lane.b32.xlu2 %v1391_v37, %s1493_s30  ;;  %v807_v30 = vmul.f32 1.442695, %v783_v25 }
 0x332   : > { %1396 = vpow2.f32 %v915_v35  ;;  %v815_v31 = vmul.f32 1.442695, %v787_v27 }
 0x333   : > { %v868_v39 = vpop.permute.xlu0 %867 }
 0x334   : > { %v901_v41 = vsub.f32 %v1848_v32, %v868_v39  ;;  %v846_v43 = vpop.permute.xlu1 %845  ;;  %v780_v39 = vsub.f32 %v1816_v17, %v1875_v42 }
 0x335   : > { %v890_v45 = vsub.f32 %v1850_v33, %v846_v43 }
 0x336   : > { %v1393_v47 = vpop.eup %1392  ;;  %v931_v48 = vmul.f32 1.442695, %v901_v41  ;;  %v801_v43 = vmul.f32 1.442695, %v780_v39 }
 0x337   : > { %v1395_v50 = vpop.eup %1394  ;;  %v909_v52 = vmul.f32 1.442695, %v890_v45  ;;  %977 = vrot.lane.b32.xlu0 %v1393_v47, %s1493_s30 }
 0x338   : > { %v1397_v54 = vpop.eup %1396  ;;  %1398 = vpow2.f32 %v931_v48  ;;  %973 = vrot.lane.b32.xlu1 %v1395_v50, %s1493_s30 }
 0x339   : > { %1400 = vpow2.f32 %v909_v52  ;;  %963 = vrot.lane.b32.xlu2 %v1397_v54, %s1493_s30 }
 0x33c   : > { %v870_v55 = vpop.permute.xlu1 %869 }
 0x33d   : > { %v902_v58 = vsub.f32 %v1852_v34, %v870_v55 }
 0x33e   : > { %v1399_v60 = vpop.eup %1398 }
 0x33f   : > { %v1401_v61 = vpop.eup %1400  ;;  %v933_v0 = vmul.f32 1.442695, %v902_v58 }
 0x340   : > { %979 = vrot.lane.b32.xlu1 %v1399_v60, %s1493_s30  ;;  %v784_v60 = vsub.f32 %v1830_v22, %v1898_v53 }
 0x341   : > { %1402 = vpow2.f32 %v933_v0  ;;  %957 = vrot.lane.b32.xlu2 %v1401_v61, %s1493_s30 }
 0x342   : > { %1404 = vpow2.f32 %v799_v9  ;;  %v809_v1 = vmul.f32 1.442695, %v784_v60 }
 0x347   : > { %v1403_v5 = vpop.eup %1402 }
 0x348   : > { %v1405_v10 = vpop.eup %1404 }
 0x349   : > { %981 = vrot.lane.b32.xlu2 %v1403_v5, %s1493_s30 }
 0x35a   : > { %v960_v13 = vpop.permute.xlu0 %959 }
 0x35b   : > { %v1003_v14 = vadd.f32 %v1405_v10, %v960_v13 }
 0x35d   : > { %1406 = vlog2.f32 %v1003_v14 }
 0x35e   : > { %1408 = vpow2.f32 %v791_v24 }
 0x35f   : > { %1410 = vpow2.f32 %v807_v30 }
 0x360   : > { %1412 = vpow2.f32 %v815_v31 }
 0x363   : > { %v1407_v15 = vpop.eup %1406 }
 0x364   : > { %v1024_v20 = vmul.f32 0.6931472, %v1407_v15  ;;  %v1409_v35 = vpop.eup %1408 }
 0x365   : > { %v1411_v47 = vpop.eup %1410 }
 0x366   : > { %v1051_v23 = vadd.f32 %v1024_v20, %v1865_v38  ;;  %v776_v38 = vsub.f32 %v1820_v19, %v1890_v49  ;;  %v1413_v48 = vpop.eup %1412 }
 0x368   : > { %1085 = vperm.xlu2 %1369, %v1051_v23   ;;  %v793_v45 = vmul.f32 1.442695, %v776_v38  ;;  %v781_v23 = vsub.f32 %v1838_v28, %v1911_v59  ;;  %v778_v38 = vsub.f32 %v1850_v33, %v1923_v63 }
 0x36a   : > { %v803_v27 = vmul.f32 1.442695, %v781_v23 }
 0x372   : > { %v952_v37 = vpop.permute.xlu2 %951 }
 0x373   : > { %v999_v41 = vadd.f32 %v1409_v35, %v952_v37 }
 0x375   : > { %1414 = vlog2.f32 %v999_v41 }
 0x376   : > { %1416 = vpow2.f32 %v801_v43 }
 0x377   : > { %1418 = vpow2.f32 %v793_v45 }
 0x37a   : > { %v976_v50 = vpop.permute.xlu2 %975  ;;  %v968_v52 = vpop.permute.xlu1 %967 }
 0x37b   : > { %v1415_v54 = vpop.eup %1414  ;;  %v1011_v55 = vadd.f32 %v1413_v48, %v976_v50  ;;  %v1007_v58 = vadd.f32 %v1411_v47, %v968_v52  ;;  %v777_v48 = vsub.f32 %v1828_v21, %v1895_v51 }
 0x37c   : > { %v1016_v61 = vmul.f32 0.6931472, %v1415_v54  ;;  %v1417_v5 = vpop.eup %1416  ;;  %v785_v54 = vsub.f32 %v1836_v26, %v1908_v57 }
 0x37d   : > { %1420 = vlog2.f32 %v1011_v55  ;;  %v1419_v6 = vpop.eup %1418 }
 0x37e   : > { %1422 = vlog2.f32 %v1007_v58  ;;  %v1047_v0 = vadd.f32 %v1016_v61, %v1880_v44  ;;  %v790_v58 = vsub.f32 %v1852_v34, %v1933_v3  ;;  %v811_v61 = vmul.f32 1.442695, %v785_v54 }
 0x37f   : > { %1424 = vpow2.f32 %v809_v1 }
 0x380   : > { %1065 = vperm.xlu0 %1368, %v1047_v0   ;;  %v821_v0 = vmul.f32 1.442695, %v790_v58 }
 0x382   : > { %v954_v9 = vpop.permute.xlu0 %953 }
 0x383   : > { %v1421_v10 = vpop.eup %1420  ;;  %v962_v13 = vpop.permute.xlu1 %961  ;;  %v1000_v14 = vadd.f32 %v1419_v6, %v954_v9 }
 0x384   : > { %v1423_v15 = vpop.eup %1422  ;;  %v1040_v16 = vmul.f32 0.6931472, %v1421_v10  ;;  %v1004_v20 = vadd.f32 %v1417_v5, %v962_v13  ;;  %v786_v5 = vsub.f32 %v1840_v29, %v1905_v56  ;;  %v782_v10 = vsub.f32 %v1860_v36, %v1930_v2 }
 0x385   : > { %v1032_v24 = vmul.f32 0.6931472, %v1423_v15  ;;  %1426 = vlog2.f32 %v1000_v14  ;;  %v1425_v30 = vpop.eup %1424 }
 0x386   : > { %1428 = vlog2.f32 %v1004_v20  ;;  %v1059_v44 = vadd.f32 %v1040_v16, %v1885_v46  ;;  %v813_v15 = vmul.f32 1.442695, %v786_v5  ;;  %v805_v16 = vmul.f32 1.442695, %v782_v10 }
 0x387   : > { %v1055_v25 = vadd.f32 %v1032_v24, %v1870_v40  ;;  %1430 = vpow2.f32 %v803_v27  ;;  %v797_v40 = vmul.f32 1.442695, %v778_v38 }
 0x388   : > { %1125 = vperm.xlu1 %1370, %v1059_v44  }
 0x389   : > { %1105 = vperm.xlu0 %1368, %v1055_v25  }
 0x38b   : > { %v1427_v31 = vpop.eup %1426  ;;  %v970_v35 = vpop.permute.xlu2 %969 }
 0x38c   : > { %v1429_v37 = vpop.eup %1428  ;;  %v1018_v39 = vmul.f32 0.6931472, %v1427_v31  ;;  %v1008_v41 = vadd.f32 %v1425_v30, %v970_v35  ;;  %v789_v35 = vsub.f32 %v1848_v32, %v1920_v62 }
 0x38d   : > { %v1026_v43 = vmul.f32 0.6931472, %v1429_v37  ;;  %v1431_v47 = vpop.eup %1430 }
 0x38e   : > { %1432 = vlog2.f32 %v1008_v41  ;;  %v1048_v45 = vadd.f32 %v1018_v39, %v1890_v49 }
 0x38f   : > { %v1052_v46 = vadd.f32 %v1026_v43, %v1875_v42  ;;  %1434 = vpow2.f32 %v797_v40  ;;  %v795_v42 = vmul.f32 1.442695, %v777_v48  ;;  %v819_v43 = vmul.f32 1.442695, %v789_v35 }
 0x390   : > { %1070 = vperm.xlu1 %1370, %v1048_v45  }
 0x391   : > { %1090 = vperm.xlu0 %1368, %v1052_v46   ;;  %v972_v20 = vpop.permute.xlu0 %971 }
 0x393   : > { %v964_v50 = vpop.permute.xlu2 %963 }
 0x394   : > { %v1433_v52 = vpop.eup %1432  ;;  %v1005_v55 = vadd.f32 %v1431_v47, %v964_v50 }
 0x395   : > { %v1034_v49 = vmul.f32 0.6931472, %v1433_v52  ;;  %v1435_v1 = vpop.eup %1434 }
 0x396   : > { %1436 = vlog2.f32 %v1005_v55 }
 0x397   : > { %v1056_v60 = vadd.f32 %v1034_v49, %v1898_v53  ;;  %1438 = vpow2.f32 %v795_v42 }
 0x398   : > { %1440 = vpow2.f32 %v811_v61 }
 0x399   : > { %1110 = vperm.xlu1 %1370, %v1056_v60   ;;  %1442 = vpow2.f32 %v821_v0 }
 0x39b   : > { %v958_v6 = vpop.permute.xlu2 %957 }
 0x39c   : > { %v1437_v9 = vpop.eup %1436  ;;  %v1002_v13 = vadd.f32 %v1435_v1, %v958_v6 }
 0x39d   : > { %v1028_v14 = vmul.f32 0.6931472, %v1437_v9  ;;  %v1439_v23 = vpop.eup %1438 }
 0x39e   : > { %1444 = vlog2.f32 %v1002_v13  ;;  %v1441_v24 = vpop.eup %1440 }
 0x39f   : > { %v1053_v53 = vadd.f32 %v1028_v14, %v1911_v59  ;;  %v1443_v25 = vpop.eup %1442  ;;  %1446 = vpow2.f32 %v813_v15  ;;  %v1009_v39 = vadd.f32 %v1441_v24, %v972_v20  ;;  %v788_v59 = vsub.f32 %v1818_v18, %v1940_v4 }
 0x3a0   : > { %1448 = vpow2.f32 %v805_v16 }
 0x3a1   : > { %1095 = vperm.xlu1 %1370, %v1053_v53   ;;  %v966_v45 = vpop.permute.xlu0 %965  ;;  %v817_v47 = vmul.f32 1.442695, %v788_v59 }
 0x3a2   : > { %v956_v44 = vpop.permute.xlu1 %955 }
 0x3a3   : > { %v1001_v27 = vadd.f32 %v1439_v23, %v956_v44  ;;  %v982_v30 = vpop.permute.xlu2 %981 }
 0x3a4   : > { %v1445_v31 = vpop.eup %1444  ;;  %v1014_v37 = vadd.f32 %v1443_v25, %v982_v30 }
 0x3a5   : > { %v1022_v41 = vmul.f32 0.6931472, %v1445_v31  ;;  %1450 = vlog2.f32 %v1001_v27  ;;  %v1447_v46 = vpop.eup %1446 }
 0x3a6   : > { %1452 = vlog2.f32 %v1014_v37  ;;  %v1449_v40 = vpop.eup %1448 }
 0x3a7   : > { %v1050_v38 = vadd.f32 %v1022_v41, %v1923_v63  ;;  %1454 = vlog2.f32 %v1009_v39  ;;  %v1006_v58 = vadd.f32 %v1449_v40, %v966_v45 }
 0x3a8   : > { %1456 = vpow2.f32 %v819_v43 }
 0x3a9   : > { %1080 = vperm.xlu1 %1370, %v1050_v38   ;;  %v978_v1 = vpop.permute.xlu0 %977 }
 0x3aa   : > { %v974_v48 = vpop.permute.xlu1 %973 }
 0x3ab   : > { %v1451_v50 = vpop.eup %1450  ;;  %v1010_v52 = vadd.f32 %v1447_v46, %v974_v48 }
 0x3ac   : > { %v1453_v54 = vpop.eup %1452  ;;  %v1020_v55 = vmul.f32 0.6931472, %v1451_v50 }
 0x3ad   : > { %v1046_v49 = vmul.f32 0.6931472, %v1453_v54  ;;  %1458 = vlog2.f32 %v1010_v52  ;;  %v1455_v63 = vpop.eup %1454 }
 0x3ae   : > { %1460 = vpow2.f32 %v817_v47  ;;  %v1049_v42 = vadd.f32 %v1020_v55, %v1895_v51  ;;  %v1457_v61 = vpop.eup %1456  ;;  %v1036_v0 = vmul.f32 0.6931472, %v1455_v63 }
 0x3af   : > { %v1062_v60 = vadd.f32 %v1046_v49, %v1933_v3  ;;  %1462 = vlog2.f32 %v1006_v58 }
 0x3b0   : > { %1075 = vperm.xlu2 %1369, %v1049_v42   ;;  %v1057_v51 = vadd.f32 %v1036_v0, %v1908_v57 }
 0x3b1   : > { %1140 = vperm.xlu1 %1370, %v1062_v60  }
 0x3b2   : > { %v980_v5 = vpop.permute.xlu1 %979 }
 0x3b3   : > { %v1459_v6 = vpop.eup %1458  ;;  %v1013_v9 = vadd.f32 %v1457_v61, %v980_v5 }
 0x3b4   : > { %v1461_v10 = vpop.eup %1460  ;;  %v1038_v13 = vmul.f32 0.6931472, %v1459_v6 }
 0x3b5   : > { %v1012_v14 = vadd.f32 %v1461_v10, %v978_v1  ;;  %1464 = vlog2.f32 %v1013_v9  ;;  %v1463_v53 = vpop.eup %1462 }
 0x3b6   : > { %v1058_v15 = vadd.f32 %v1038_v13, %v1905_v56  ;;  %v1030_v3 = vmul.f32 0.6931472, %v1463_v53 }
 0x3b7   : > { %1466 = vlog2.f32 %v1012_v14 }
 0x3b8   : > { %1120 = vperm.xlu0 %1368, %v1058_v15   ;;  %1115 = vperm.xlu2 %1369, %v1057_v51   ;;  %v1054_v24 = vadd.f32 %v1030_v3, %v1930_v2 }
 0x3bb   : > { %v1465_v16 = vpop.eup %1464 }
 0x3bc   : > { %v1044_v20 = vmul.f32 0.6931472, %v1465_v16 }
 0x3bd   : > { %v1467_v44 = vpop.eup %1466 }
 0x3be   : > { %v1061_v23 = vadd.f32 %v1044_v20, %v1920_v62  ;;  %v1042_v25 = vmul.f32 0.6931472, %v1467_v44 }
 0x3c0   : > { %1135 = vperm.xlu0 %1368, %v1061_v23   ;;  %1100 = vperm.xlu2 %1369, %v1054_v24   ;;  %v1060_v57 = vadd.f32 %v1042_v25, %v1940_v4 }
 0x3c2   : > { %v1086_v27 = vpop.permute.xlu2 %1085 }
 0x3c3   : > { %v1147_v56 = vsub.f32 %v1802_v8, %v1086_v27 }
 0x3c5   : > { %1164 = vst.msk [vmem:[%s2118_s5 + $0x20] sm:$0xff] %vm1159_vm2, %v1147_v56 }
 0x3c8   : > { %1130 = vperm.xlu2 %1369, %v1060_v57  }
 0x3f2   : > { %v1066_v30 = vpop.permute.xlu0 %1065 }
 0x3f3   : > { %v1143_v62 = vsub.f32 %v1800_v7, %v1066_v30 }
 0x3f5   : > { %1160 = vst.msk [vmem:[%s2118_s5] sm:$0xff] %vm1159_vm2, %v1143_v62 }
 0x3fa   : > { %v1126_v2 = vpop.permute.xlu1 %1125 }
 0x3fb   : > { %v1155_v31 = vsub.f32 %v1810_v12, %v1126_v2  ;;  %v1106_v8 = vpop.permute.xlu0 %1105 }
 0x3fc   : > { %v1151_v35 = vsub.f32 %v1808_v11, %v1106_v8 }
 0x3fd   : > { %1172 = vst.msk [vmem:[%s2118_s5 + $0x60] sm:$0xff] %vm1159_vm2, %v1155_v31 }
 0x3fe   : > { %1168 = vst.msk [vmem:[%s2118_s5 + $0x40] sm:$0xff] %vm1159_vm2, %v1151_v35 }
 0x402   : > { %v1071_v7 = vpop.permute.xlu1 %1070 }
 0x403   : > { %v1144_v4 = vsub.f32 %v1820_v19, %v1071_v7  ;;  %v1091_v37 = vpop.permute.xlu0 %1090 }
 0x404   : > { %v1148_v39 = vsub.f32 %v1816_v17, %v1091_v37 }
 0x405   : > { %1161 = vst.msk [vmem:[%s2118_s5 + $0x8] sm:$0xff] %vm1159_vm2, %v1144_v4 }
 0x406   : > { %1165 = vst.msk [vmem:[%s2118_s5 + $0x28] sm:$0xff] %vm1159_vm2, %v1148_v39 }
 0x40a   : > { %v1076_v11 = vpop.permute.xlu2 %1075 }
 0x40b   : > { %v1145_v12 = vsub.f32 %v1828_v21, %v1076_v11  ;;  %v1111_v41 = vpop.permute.xlu1 %1110 }
 0x40c   : > { %v1152_v59 = vsub.f32 %v1830_v22, %v1111_v41 }
 0x40d   : > { %1162 = vst.msk [vmem:[%s2118_s5 + $0x10] sm:$0xff] %vm1159_vm2, %v1145_v12 }
 0x40e   : > { %1169 = vst.msk [vmem:[%s2118_s5 + $0x48] sm:$0xff] %vm1159_vm2, %v1152_v59 }
 0x412   : > { %v1116_v17 = vpop.permute.xlu2 %1115 }
 0x413   : > { %v1153_v19 = vsub.f32 %v1836_v26, %v1116_v17  ;;  %v1096_v38 = vpop.permute.xlu1 %1095 }
 0x414   : > { %v1149_v43 = vsub.f32 %v1838_v28, %v1096_v38 }
 0x415   : > { %1170 = vst.msk [vmem:[%s2118_s5 + $0x50] sm:$0xff] %vm1159_vm2, %v1153_v19 }
 0x416   : > { %1166 = vst.msk [vmem:[%s2118_s5 + $0x30] sm:$0xff] %vm1159_vm2, %v1149_v43 }
 0x41a   : > { %v1101_v21 = vpop.permute.xlu2 %1100 }
 0x41b   : > { %v1150_v22 = vsub.f32 %v1860_v36, %v1101_v21  ;;  %v1081_v45 = vpop.permute.xlu1 %1080 }
 0x41c   : > { %v1146_v46 = vsub.f32 %v1850_v33, %v1081_v45 }
 0x41d   : > { %1167 = vst.msk [vmem:[%s2118_s5 + $0x38] sm:$0xff] %vm1159_vm2, %v1150_v22 }
 0x41e   : > { %1163 = vst.msk [vmem:[%s2118_s5 + $0x18] sm:$0xff] %vm1159_vm2, %v1146_v46 }
 0x422   : > { %v1131_v26 = vpop.permute.xlu2 %1130 }
 0x423   : > { %v1156_v28 = vsub.f32 %v1818_v18, %v1131_v26  ;;  %v1141_v40 = vpop.permute.xlu1 %1140 }
 0x424   : > { %v1158_v47 = vsub.f32 %v1852_v34, %v1141_v40 }
 0x425   : > { %1173 = vst.msk [vmem:[%s2118_s5 + $0x68] sm:$0xff] %vm1159_vm2, %v1156_v28 }
 0x426   : > { %1175 = vst.msk [vmem:[%s2118_s5 + $0x78] sm:$0xff] %vm1159_vm2, %v1158_v47 }
 0x42a   : > { %v1121_v33 = vpop.permute.xlu0 %1120 }
 0x42b   : > { %v1154_v36 = vsub.f32 %v1840_v29, %v1121_v33 }
 0x42d   : > { %1171 = vst.msk [vmem:[%s2118_s5 + $0x58] sm:$0xff] %vm1159_vm2, %v1154_v36 }
 0x432   : > { %v1136_v18 = vpop.permute.xlu0 %1135 }
 0x433   : > { %v1157_v34 = vsub.f32 %v1848_v32, %v1136_v18 }
 0x435   : > { %1174 = vst.msk [vmem:[%s2118_s5 + $0x70] sm:$0xff] %vm1159_vm2, %v1157_v34 }
 0x436 PF: > { %s15_s20 = sadd.s32 1, %s1490_s20   ;;  %s2119_s18 = smov %s1486_s19 }
 0x437   : > { %p12_p6 = scmp.ge.s32.totalorder %s15_s20, 4   ;;  %s2120_s19 = smov %s2122_s21 }
 0x439   :  { %14 = sbr.rel (!%p12_p6) target bundleno = 2 (0x2), region = 78 }

</bundles_post_ra>
